<compile_context>
chip_gen: v7x
topology: tpu7x:2x2x1
jax: 0.10.0
libtpu: 0.0.40
codegen_flags: <defaults>
</compile_context>

<pallas_src>
import functools
import math

import jax
import jax.numpy as jnp
from jax.experimental import pallas as pl
from jax.experimental.pallas import tpu as pltpu


def _cross_attn_kernel(x_ref, ctx_ref, wq_ref, wkv_ref, wo_ref, bo_ref,
                       o_ref, acc_ref, *, head_dim, mxu_dtype, approx_recip):
    """One grid step = (batch block b, query tile i, head h)."""
    h = pl.program_id(2)

    @pl.when(h == 0)
    def _init():
        acc_ref[...] = jnp.zeros_like(acc_ref)

    bb, tq, C = x_ref.shape
    _, M, C_ctx = ctx_ref.shape
    Dh = head_dim

    # Flatten activations to 2-D so the three projections are plain MXU
    # matmuls; operands in mxu_dtype (bf16 by default), accumulation in f32.
    x = x_ref[...].astype(mxu_dtype).reshape(bb * tq, C)
    ctx = ctx_ref[...].astype(mxu_dtype).reshape(bb * M, C_ctx)

    # Per-head projections. 1/sqrt(Dh) is pre-folded into Wq; K and V share a
    # fused (C_ctx, 2*Dh) slab -> one ctx matmul fills 2*Dh output lanes.
    q = jnp.dot(x, wq_ref[0], preferred_element_type=jnp.float32)      # (bb*tq, Dh)
    kv = jnp.dot(ctx, wkv_ref[0], preferred_element_type=jnp.float32)  # (bb*M, 2*Dh)

    q = q.astype(mxu_dtype).reshape(bb, tq, Dh)
    k = kv[:, :Dh].astype(mxu_dtype).reshape(bb, M, Dh)
    v = kv[:, Dh:].astype(mxu_dtype).reshape(bb, M, Dh)

    # logits = q @ k^T : contraction over Dh, so no transpose is emitted.
    s = jnp.einsum('bnd,bmd->bnm', q, k, preferred_element_type=jnp.float32)

    # Numerically-stable softmax, kept in f32; divide -> EUP reciprocal.
    s = s - jnp.max(s, axis=-1, keepdims=True)
    p = jnp.exp(s)
    denom = jnp.sum(p, axis=-1, keepdims=True)
    if approx_recip:
        p = p * pl.reciprocal(denom, approx=True)
    else:
        p = p / denom

    # o_h = softmax @ v_h, then fold this head's share of the output
    # projection into the f32 accumulator: concat_h(o_h) @ Wo^T == sum_h o_h @ Wo_h.
    oh = jnp.einsum('bnm,bmd->bnd', p.astype(mxu_dtype), v,
                    preferred_element_type=jnp.float32)                # (bb, tq, Dh)
    oh2 = oh.astype(mxu_dtype).reshape(bb * tq, Dh)
    acc_ref[...] += jnp.dot(oh2, wo_ref[0], preferred_element_type=jnp.float32)

    @pl.when(h == pl.num_programs(2) - 1)
    def _finalize():
        out = acc_ref[...] + bo_ref[...]                               # (bb*tq, C) + (1, C)
        o_ref[...] = out.reshape(bb, tq, C).astype(o_ref.dtype)


def _min_sublane(dtype):
    return 8 * max(1, 4 // jnp.dtype(dtype).itemsize)


def _pick_q_tile(n, dtype):
    min_sub = _min_sublane(dtype)
    for t in (512, 256, 128, 64, 32, 16, 8):
        if t % min_sub == 0 and n % t == 0:
            return t
    return n  # fall back to the full (untiled) query length


def _nbytes(shape, dtype):
    return math.prod(shape) * jnp.dtype(dtype).itemsize


def cross_attention(x, context, wq, wkv, wo, bo, *, num_heads,
                    q_block=None, batch_block=None,
                    use_bf16_mxu=True, approx_recip=True):
    """x: (B, N, C), context: (B, M, C_ctx). Returns (B, N, C).

    wq: (C, C), wkv: (2C, C_ctx), wo: (C, C), bo: (C,) in PyTorch Linear layout
    (out_features, in_features). attn_drop / proj_drop are identity (eval /
    p = 0.0); `mask` is unused by the reference (non-xformers) forward.
    """
    B, N, C = x.shape
    Bc, M, C_ctx = context.shape
    assert Bc == B, "batch mismatch between x and context"
    assert C % num_heads == 0, "dim must be divisible by num_heads"
    assert wq.shape == (C, C) and wkv.shape == (2 * C, C_ctx) and wo.shape == (C, C)
    H = num_heads
    Dh = C // H
    scale = Dh ** (-0.5)

    mxu_dtype = jnp.bfloat16 if use_bf16_mxu else x.dtype

    # --- One-time (XLA, outside the kernel) weight preparation ---------------
    wq_h = (wq * scale).T.reshape(C, H, Dh).transpose(1, 0, 2)       # (H, C, Dh)
    wk_h = wkv[:C].T.reshape(C_ctx, H, Dh).transpose(1, 0, 2)        # (H, C_ctx, Dh)
    wv_h = wkv[C:].T.reshape(C_ctx, H, Dh).transpose(1, 0, 2)        # (H, C_ctx, Dh)
    wkv_h = jnp.concatenate([wk_h, wv_h], axis=-1)                   # (H, C_ctx, 2*Dh)
    wo_h = wo.T.reshape(H, Dh, C)                                    # (H, Dh, C)
    wq_h = wq_h.astype(mxu_dtype)
    wkv_h = wkv_h.astype(mxu_dtype)
    wo_h = wo_h.astype(mxu_dtype)
    bo2d = bo.reshape(1, C).astype(jnp.float32)

    # --- Tiling ---------------------------------------------------------------
    tq = q_block if q_block is not None else _pick_q_tile(N, x.dtype)
    assert N % tq == 0, "q_block must divide N"
    if batch_block is None:
        # Small-sequence regime: pack batches per block so grid steps aren't
        # dominated by fixed per-step overhead / masked partial stores.
        batch_block = B if (N <= 64 and M <= 64) else 1
    bb = batch_block
    assert B % bb == 0, "batch_block must divide B"

    grid = (B // bb, N // tq, H)

    # --- VMEM budget ----------------------------------------------------------
    block_bytes = (
        2 * _nbytes((bb, tq, C), x.dtype)             # x (double buffered)
        + 2 * _nbytes((bb, M, C_ctx), context.dtype)  # context
        + 2 * _nbytes((1, C, Dh), mxu_dtype)          # Wq (per head)
        + 2 * _nbytes((1, C_ctx, 2 * Dh), mxu_dtype)  # Wk|Wv (per head)
        + 2 * _nbytes((1, Dh, C), mxu_dtype)          # Wo (per head)
        + 2 * _nbytes((1, C), jnp.float32)            # bias
        + 2 * _nbytes((bb, tq, C), x.dtype)           # out
        + _nbytes((bb * tq, C), jnp.float32)          # f32 accumulator scratch
    )
    interm_bytes = 4 * (bb * tq * M + bb * (tq + 2 * M) * Dh) * 3  # logits / q / k / v
    vmem_limit = int(min(100 * 2**20, max(32 * 2**20, 2 * (block_bytes + interm_bytes))))

    kernel = functools.partial(_cross_attn_kernel, head_dim=Dh,
                               mxu_dtype=mxu_dtype, approx_recip=approx_recip)

    # TODO(synk): for very long M on v7x (64 MiB VMEM), add a key/value tile
    # grid axis with a flash-style online softmax (running max/sum/acc scratch
    # and -inf masking of padded key columns) instead of full-(tq, M) logits.
    return pl.pallas_call(
        kernel,
        out_shape=jax.ShapeDtypeStruct((B, N, C), x.dtype),
        grid_spec=pltpu.PrefetchScalarGridSpec(
            num_scalar_prefetch=0,
            grid=grid,
            in_specs=[
                pl.BlockSpec((bb, tq, C), lambda b, i, h: (b, i, 0)),         # x
                pl.BlockSpec((bb, M, C_ctx), lambda b, i, h: (b, 0, 0)),      # context
                pl.BlockSpec((1, C, Dh), lambda b, i, h: (h, 0, 0)),          # Wq (scaled)
                pl.BlockSpec((1, C_ctx, 2 * Dh), lambda b, i, h: (h, 0, 0)),  # Wk|Wv fused
                pl.BlockSpec((1, Dh, C), lambda b, i, h: (h, 0, 0)),          # Wo
                pl.BlockSpec((1, C), lambda b, i, h: (0, 0)),                 # proj bias
            ],
            out_specs=pl.BlockSpec((bb, tq, C), lambda b, i, h: (b, i, 0)),
            scratch_shapes=[pltpu.VMEM((bb * tq, C), jnp.float32)],
        ),
        compiler_params=pltpu.CompilerParams(
            dimension_semantics=("parallel", "parallel", "arbitrary"),
            vmem_limit_bytes=vmem_limit,
        ),
    )(x, context, wq_h, wkv_h, wo_h, bo2d)


def cross_attention_ref(x, context, wq, wkv, wo, bo, *, num_heads):
    """Pure-JAX reference mirroring the PyTorch forward (non-xformers path)."""
    B, N, C = x.shape
    _, M, _ = context.shape
    head_dim = C // num_heads
    scale = head_dim ** (-0.5)

    q = jnp.einsum('bnc,dc->bnd', x, wq).reshape(B, N, num_heads, head_dim)
    kv = jnp.einsum('bmc,dc->bmd', context, wkv).reshape(B, M, 2, num_heads, head_dim)
    q = q.transpose(0, 2, 1, 3)                  # (B, H, N, Dh)
    kv = kv.transpose(2, 0, 3, 1, 4)             # (2, B, H, M, Dh)
    k, v = kv[0], kv[1]
    attn = jnp.einsum('bhnd,bhmd->bhnm', q, k) * scale
    attn = jax.nn.softmax(attn, axis=-1)
    out = jnp.einsum('bhnm,bhmd->bhnd', attn, v)
    out = out.transpose(0, 2, 1, 3).reshape(B, N, C)
    return jnp.einsum('bnc,dc->bnd', out, wo) + bo


if __name__ == "__main__":
    # Small shapes consistent with the module.
    B, N, M = 2, 8, 8
    C = 32          # dim
    C_ctx = 32      # dim_context (defaults to dim)
    num_heads = 8   # head_dim = 4

    key = jax.random.PRNGKey(0)
    kx, kc, kq, kkv, kwo, kbo = jax.random.split(key, 6)

    x = jax.random.normal(kx, (B, N, C), dtype=jnp.float32)
    context = jax.random.normal(kc, (B, M, C_ctx), dtype=jnp.float32)

    # Deterministic parameter init (PyTorch Linear weight layout: (out, in)).
    def lin_init(k, out_f, in_f):
        bound = 1.0 / math.sqrt(in_f)
        return jax.random.uniform(k, (out_f, in_f), jnp.float32, -bound, bound)

    wq = lin_init(kq, C, C)                 # q:    Linear(dim, dim, bias=False)
    wkv = lin_init(kkv, 2 * C, C_ctx)       # kv:   Linear(dim_context, 2*dim, bias=False)
    wo = lin_init(kwo, C, C)                # proj: Linear(dim, dim) with bias
    bo = jax.random.uniform(kbo, (C,), jnp.float32,
                            -1.0 / math.sqrt(C), 1.0 / math.sqrt(C))

    ref = cross_attention_ref(x, context, wq, wkv, wo, bo, num_heads=num_heads)

    # Default fast path: bf16 MXU operands (f32 accumulation), EUP reciprocal.
    out = cross_attention(x, context, wq, wkv, wo, bo, num_heads=num_heads)
    out = jax.block_until_ready(out)
    assert out.shape == (B, N, C)
    err = jnp.max(jnp.abs(out - ref))
    assert jnp.allclose(out, ref, atol=5e-2, rtol=5e-2), \
        f"bf16-MXU path: max abs err = {err}"

    # Precision path: f32 MXU operands, exact divide (loss-sensitive callers).
    out_f32 = cross_attention(x, context, wq, wkv, wo, bo, num_heads=num_heads,
                              use_bf16_mxu=False, approx_recip=False)
    out_f32 = jax.block_until_ready(out_f32)
    err_f32 = jnp.max(jnp.abs(out_f32 - ref))
    assert jnp.allclose(out_f32, ref, atol=2e-3, rtol=2e-3), \
        f"f32-MXU path: max abs err = {err_f32}"

    print("KERNEL_OK")
</pallas_src>

<mosaic_0001>
module attributes {stable_mosaic.version = 11 : i64} {
  func.func @_cross_attn_kernel(%arg0: i32, %arg1: i32, %arg2: i32, %arg3: memref<2x8x32xf32, #tpu.memory_space<vmem>>, %arg4: memref<2x8x32xf32, #tpu.memory_space<vmem>>, %arg5: memref<1x32x4xbf16, #tpu.memory_space<vmem>>, %arg6: memref<1x32x8xbf16, #tpu.memory_space<vmem>>, %arg7: memref<1x4x32xbf16, #tpu.memory_space<vmem>>, %arg8: memref<1x32xf32, #tpu.memory_space<vmem>>, %arg9: memref<2x8x32xf32, #tpu.memory_space<vmem>>, %arg10: memref<16x32xf32, #tpu.memory_space<vmem>>) attributes {dimension_semantics = [#tpu.dimension_semantics<parallel>, #tpu.dimension_semantics<parallel>, #tpu.dimension_semantics<arbitrary>], iteration_bounds = array<i64: 1, 1, 8>, scalar_prefetch = 0 : i64, scratch_operands = 1 : i64, tpu.core_type = #tpu.core_type<tc>, window_params = [{transform_indices = @transform_0, window_bounds = array<i64: 2, 8, 32>}, {transform_indices = @transform_1, window_bounds = array<i64: 2, 8, 32>}, {transform_indices = @transform_2, window_bounds = array<i64: 1, 32, 4>}, {transform_indices = @transform_3, window_bounds = array<i64: 1, 32, 8>}, {transform_indices = @transform_4, window_bounds = array<i64: 1, 4, 32>}, {pipeline_mode = #tpu.pipeline_mode<synchronous>, transform_indices = @transform_5, window_bounds = array<i64: 1, 32>}, {transform_indices = @transform_6, window_bounds = array<i64: 2, 8, 32>}]} {
    %c0_i32 = arith.constant 0 : i32
    %0 = arith.cmpi eq, %arg2, %c0_i32 : i32
    %1 = arith.extui %0 : i1 to i32
    %c0_i32_0 = arith.constant 0 : i32
    %2 = arith.cmpi ne, %1, %c0_i32_0 : i32
    scf.if %2 {
      %cst_26 = arith.constant 0.000000e+00 : f32
      %47 = vector.broadcast %cst_26 : f32 to vector<16x32xf32>
      %c0_27 = arith.constant 0 : index
      %c0_28 = arith.constant 0 : index
      %48 = vector.load %arg10[%c0_27, %c0_28] : memref<16x32xf32, #tpu.memory_space<vmem>>, vector<16x32xf32>
      tpu.vector_store %arg10[%c0_27, %c0_28], %47 {strides = array<i32>} : memref<16x32xf32, #tpu.memory_space<vmem>>, vector<16x32xf32>,
    } else {
    }
    %c0 = arith.constant 0 : index
    %c0_1 = arith.constant 0 : index
    %c0_2 = arith.constant 0 : index
    %3 = vector.load %arg3[%c0, %c0_1, %c0_2] : memref<2x8x32xf32, #tpu.memory_space<vmem>>, vector<2x8x32xf32>
    %4 = arith.truncf %3 : vector<2x8x32xf32> to vector<2x8x32xbf16>
    %5 = vector.shape_cast %4 : vector<2x8x32xbf16> to vector<16x32xbf16>
    %c0_3 = arith.constant 0 : index
    %c0_4 = arith.constant 0 : index
    %c0_5 = arith.constant 0 : index
    %6 = vector.load %arg4[%c0_3, %c0_4, %c0_5] : memref<2x8x32xf32, #tpu.memory_space<vmem>>, vector<2x8x32xf32>
    %7 = arith.truncf %6 : vector<2x8x32xf32> to vector<2x8x32xbf16>
    %8 = vector.shape_cast %7 : vector<2x8x32xbf16> to vector<16x32xbf16>
    %c0_6 = arith.constant 0 : index
    %c0_7 = arith.constant 0 : index
    %c0_8 = arith.constant 0 : index
    %9 = vector.load %arg5[%c0_6, %c0_7, %c0_8] : memref<1x32x4xbf16, #tpu.memory_space<vmem>>, vector<1x32x4xbf16>
    %10 = vector.shape_cast %9 : vector<1x32x4xbf16> to vector<32x4xbf16>
    %cst = arith.constant dense<0.000000e+00> : vector<16x4xf32>
    %11 = tpu.matmul %5, %10, %cst {dimension_numbers = #tpu.dot_dimension_numbers<[1], [0], [0], [1], [0, 0, 1, 1], [], []>} : vector<16x32xbf16>, vector<32x4xbf16>, vector<16x4xf32> -> vector<16x4xf32>
    %c0_9 = arith.constant 0 : index
    %c0_10 = arith.constant 0 : index
    %c0_11 = arith.constant 0 : index
    %12 = vector.load %arg6[%c0_9, %c0_10, %c0_11] : memref<1x32x8xbf16, #tpu.memory_space<vmem>>, vector<1x32x8xbf16>
    %13 = vector.shape_cast %12 : vector<1x32x8xbf16> to vector<32x8xbf16>
    %cst_12 = arith.constant dense<0.000000e+00> : vector<16x8xf32>
    %14 = tpu.matmul %8, %13, %cst_12 {dimension_numbers = #tpu.dot_dimension_numbers<[1], [0], [0], [1], [0, 0, 1, 1], [], []>} : vector<16x32xbf16>, vector<32x8xbf16>, vector<16x8xf32> -> vector<16x8xf32>
    %15 = arith.truncf %11 : vector<16x4xf32> to vector<16x4xbf16>
    %16 = vector.shape_cast %15 : vector<16x4xbf16> to vector<2x8x4xbf16>
    %17 = vector.extract_strided_slice %14 {offsets = [0, 0], sizes = [16, 4], strides = [1, 1]} : vector<16x8xf32> to vector<16x4xf32>
    %18 = arith.truncf %17 : vector<16x4xf32> to vector<16x4xbf16>
    %19 = vector.shape_cast %18 : vector<16x4xbf16> to vector<2x8x4xbf16>
    %20 = vector.extract_strided_slice %14 {offsets = [0, 4], sizes = [16, 4], strides = [1, 1]} : vector<16x8xf32> to vector<16x4xf32>
    %21 = arith.truncf %20 : vector<16x4xf32> to vector<16x4xbf16>
    %22 = vector.shape_cast %21 : vector<16x4xbf16> to vector<2x8x4xbf16>
    "tpu.trace_start"() <{level = 10 : i32, message = "bnd,bmd->bnm"}> : () -> ()
    %cst_13 = arith.constant dense<0.000000e+00> : vector<2x8x8xf32>
    %23 = tpu.matmul %16, %19, %cst_13 {dimension_numbers = #tpu.dot_dimension_numbers<[2], [2], [1], [1], [0, 0, 0, 1, 1, 1], [0], [0]>} : vector<2x8x4xbf16>, vector<2x8x4xbf16>, vector<2x8x8xf32> -> vector<2x8x8xf32>
    "tpu.trace_stop"() : () -> ()
    %cst_14 = arith.constant dense<0xFF800000> : vector<2x8xf32>
    %24 = vector.multi_reduction <maximumf>, %23, %cst_14 [2] : vector<2x8x8xf32> to vector<2x8xf32>
    %25 = vector.shape_cast %24 : vector<2x8xf32> to vector<2x8x1xf32>
    %26 = vector.broadcast %25 : vector<2x8x1xf32> to vector<2x8x8xf32>
    %27 = arith.subf %23, %26 : vector<2x8x8xf32>
    %28 = math.exp %27 : vector<2x8x8xf32>
    %cst_15 = arith.constant dense<0.000000e+00> : vector<2x8xf32>
    %29 = vector.multi_reduction <add>, %28, %cst_15 [2] : vector<2x8x8xf32> to vector<2x8xf32>
    %30 = vector.shape_cast %29 : vector<2x8xf32> to vector<2x8x1xf32>
    %31 = tpu.reciprocal %30 {approx = true} : vector<2x8x1xf32> -> vector<2x8x1xf32>
    %32 = vector.broadcast %31 : vector<2x8x1xf32> to vector<2x8x8xf32>
    %33 = arith.mulf %28, %32 : vector<2x8x8xf32>
    %34 = arith.truncf %33 : vector<2x8x8xf32> to vector<2x8x8xbf16>
    "tpu.trace_start"() <{level = 10 : i32, message = "bnm,bmd->bnd"}> : () -> ()
    %cst_16 = arith.constant dense<0.000000e+00> : vector<2x8x4xf32>
    %35 = tpu.matmul %34, %22, %cst_16 {dimension_numbers = #tpu.dot_dimension_numbers<[2], [1], [1], [2], [0, 0, 0, 1, 1, 2], [0], [0]>} : vector<2x8x8xbf16>, vector<2x8x4xbf16>, vector<2x8x4xf32> -> vector<2x8x4xf32>
    "tpu.trace_stop"() : () -> ()
    %36 = arith.truncf %35 : vector<2x8x4xf32> to vector<2x8x4xbf16>
    %37 = vector.shape_cast %36 : vector<2x8x4xbf16> to vector<16x4xbf16>
    %c0_17 = arith.constant 0 : index
    %c0_18 = arith.constant 0 : index
    %38 = vector.load %arg10[%c0_17, %c0_18] : memref<16x32xf32, #tpu.memory_space<vmem>>, vector<16x32xf32>
    %c0_19 = arith.constant 0 : index
    %c0_20 = arith.constant 0 : index
    %c0_21 = arith.constant 0 : index
    %39 = vector.load %arg7[%c0_19, %c0_20, %c0_21] : memref<1x4x32xbf16, #tpu.memory_space<vmem>>, vector<1x4x32xbf16>
    %40 = vector.shape_cast %39 : vector<1x4x32xbf16> to vector<4x32xbf16>
    %cst_22 = arith.constant dense<0.000000e+00> : vector<16x32xf32>
    %41 = tpu.matmul %37, %40, %cst_22 {dimension_numbers = #tpu.dot_dimension_numbers<[1], [0], [0], [1], [0, 0, 1, 1], [], []>} : vector<16x4xbf16>, vector<4x32xbf16>, vector<16x32xf32> -> vector<16x32xf32>
    %42 = arith.addf %38, %41 : vector<16x32xf32>
    %c0_23 = arith.constant 0 : index
    %c0_24 = arith.constant 0 : index
    %43 = vector.load %arg10[%c0_23, %c0_24] : memref<16x32xf32, #tpu.memory_space<vmem>>, vector<16x32xf32>
    tpu.vector_store %arg10[%c0_23, %c0_24], %42 {strides = array<i32>} : memref<16x32xf32, #tpu.memory_space<vmem>>, vector<16x32xf32>,
    %c7_i32 = arith.constant 7 : i32
    %44 = arith.cmpi eq, %arg2, %c7_i32 : i32
    %45 = arith.extui %44 : i1 to i32
    %c0_i32_25 = arith.constant 0 : i32
    %46 = arith.cmpi ne, %45, %c0_i32_25 : i32
    scf.if %46 {
      %c0_26 = arith.constant 0 : index
      %c0_27 = arith.constant 0 : index
      %47 = vector.load %arg10[%c0_26, %c0_27] : memref<16x32xf32, #tpu.memory_space<vmem>>, vector<16x32xf32>
      %c0_28 = arith.constant 0 : index
      %c0_29 = arith.constant 0 : index
      %48 = vector.load %arg8[%c0_28, %c0_29] : memref<1x32xf32, #tpu.memory_space<vmem>>, vector<1x32xf32>
      %49 = vector.broadcast %48 : vector<1x32xf32> to vector<16x32xf32>
      %50 = arith.addf %47, %49 : vector<16x32xf32>
      %51 = vector.shape_cast %50 : vector<16x32xf32> to vector<2x8x32xf32>
      %c0_30 = arith.constant 0 : index
      %c0_31 = arith.constant 0 : index
      %c0_32 = arith.constant 0 : index
      %52 = vector.load %arg9[%c0_30, %c0_31, %c0_32] : memref<2x8x32xf32, #tpu.memory_space<vmem>>, vector<2x8x32xf32>
      tpu.vector_store %arg9[%c0_30, %c0_31, %c0_32], %51 {strides = array<i32>} : memref<2x8x32xf32, #tpu.memory_space<vmem>>, vector<2x8x32xf32>,
    } else {
    }
    return
  }
  func.func @transform_0(%arg0: i32, %arg1: i32, %arg2: i32) -> (i32, i32, i32) {
    %c0_i32 = arith.constant 0 : i32
    %c0_i32_0 = arith.constant 0 : i32
    return %arg0, %arg1, %c0_i32 : i32, i32, i32
  }
  func.func @transform_1(%arg0: i32, %arg1: i32, %arg2: i32) -> (i32, i32, i32) {
    %c0_i32 = arith.constant 0 : i32
    %c0_i32_0 = arith.constant 0 : i32
    %c0_i32_1 = arith.constant 0 : i32
    return %arg0, %c0_i32, %c0_i32_0 : i32, i32, i32
  }
  func.func @transform_2(%arg0: i32, %arg1: i32, %arg2: i32) -> (i32, i32, i32) {
    %c0_i32 = arith.constant 0 : i32
    %c0_i32_0 = arith.constant 0 : i32
    %c0_i32_1 = arith.constant 0 : i32
    return %arg2, %c0_i32, %c0_i32_0 : i32, i32, i32
  }
  func.func @transform_3(%arg0: i32, %arg1: i32, %arg2: i32) -> (i32, i32, i32) {
    %c0_i32 = arith.constant 0 : i32
    %c0_i32_0 = arith.constant 0 : i32
    %c0_i32_1 = arith.constant 0 : i32
    return %arg2, %c0_i32, %c0_i32_0 : i32, i32, i32
  }
  func.func @transform_4(%arg0: i32, %arg1: i32, %arg2: i32) -> (i32, i32, i32) {
    %c0_i32 = arith.constant 0 : i32
    %c0_i32_0 = arith.constant 0 : i32
    %c0_i32_1 = arith.constant 0 : i32
    return %arg2, %c0_i32, %c0_i32_0 : i32, i32, i32
  }
  func.func @transform_5(%arg0: i32, %arg1: i32, %arg2: i32) -> (i32, i32) {
    %c0_i32 = arith.constant 0 : i32
    %c0_i32_0 = arith.constant 0 : i32
    %c0_i32_1 = arith.constant 0 : i32
    return %c0_i32, %c0_i32_0 : i32, i32
  }
  func.func @transform_6(%arg0: i32, %arg1: i32, %arg2: i32) -> (i32, i32, i32) {
    %c0_i32 = arith.constant 0 : i32
    %c0_i32_0 = arith.constant 0 : i32
    return %arg0, %arg1, %c0_i32 : i32, i32, i32
  }
}

</mosaic_0001>

<bundles_post_ra>
// kernel: tpu_custom_call.1
= control target key start
LH: loop header
LB: loop body
LE: loop exit
PB: predicated region body
PF: predicated region fallthrough
CT: control target
= control target key end

     0   :  { %11 = vsyncpa [#allocation4], 0  ;;  %s1187_s21 = smov 0   ;;  %s1189_s22 = smov 0   ;;  %s1318_s0 = inlined_call_operand.vmem [shape: f32[2,8,32], index: 0, kind: input, shape index: {}]   ;;  %s1319_s1 = inlined_call_operand.vmem [shape: f32[2,8,32], index: 1, kind: input, shape index: {}]   ;;  %s1320_s2 = inlined_call_operand.vmem [shape: bf16[8,32,4], index: 2, kind: input, shape index: {}]   ;;  %s1321_s3 = inlined_call_operand.vmem [shape: bf16[8,32,8], index: 3, kind: input, shape index: {}]   ;;  %s1322_s4 = inlined_call_operand.vmem [shape: bf16[8,4,32], index: 4, kind: input, shape index: {}]   ;;  %s1323_s5 = inlined_call_operand.vmem [shape: f32[1,32], index: 5, kind: input, shape index: {}]   ;;  %s1324_s6 = inlined_call_operand.hbm [shape: f32[2,8,32], index: 6, kind: output, shape index: {}]  }
   0x1   :  { %s1191_s23 = smov 0  }
   0x2 LB: > { %s935_s24 = sadd.s32 4294967295, %s1143_s23   ;;  %s29_s25 = sadd.s32 1, %s1139_s22  ;;  %s1143_s23 = sphi %s1191_s23, %s17_s23   ;;  %s1139_s22 = sphi %s1189_s22, %s1327_s22   ;;  %s1135_s21 = sphi %s1187_s21, %s1326_s21  }
   0x3   : > { %p30_p0 = scmp.ge.s32.totalorder %s29_s25, 8  ;;  %p940_p1 = scmp.ge.s32.totalorder %s1143_s23, 1 }
   0x4   : > { %p280_p2 = scmp.lt.s32.totalorder %s1143_s23, 9 }
   0x5   : > { %s1329_s25 = smov (%p30_p0, %s29_s25), 0 }
   0x6   : > { %p281_p3 = pnand %p940_p1, %p280_p2 }
   0x7   : > { %p342_p4 = scmp.lt.s32.totalorder (!%p281_p3), %s1135_s21, 7  ;;  %p946_p5 = scmp.ne.s32.totalorder (!%p281_p3), %s1135_s21, 0 }
   0x8   : > { %284 = sbr.rel (%p281_p3) target bundleno = 1253 (0x4e5), region = 44 }
   0xf   : > { %s343_s26 = scalar_select %p342_p4, %s1135_s21, 7 }
  0x10   : > { %361 = sbr.rel (%p946_p5) target bundleno = 23 (0x17), region = 48  ;;  %vm362_vm0 = vcmask (!%p946_p5), 261120   ;;  %v1145_v0 = vmov (!%p946_p5), 0.0  }
  0x11   : > { %s971_s27 = sshll.u32 %s343_s26, 4  ;;  %s945_s28 = sshll.u32 %s343_s26, 1  ;;  %363 = vst.msk [vmem:[#allocation2] sm:$0xff] (!%p946_p5), %vm362_vm0, %v1145_v0  ;;  %364 = vst.msk [vmem:[#allocation2 + $0x8] sm:$0xff] (!%p946_p5), %vm362_vm0, %v1145_v0 }
  0x12   : > { %s346_s7 = scalar_lea.vmem %s1320_s2, %s971_s27  ;;  %s351_s10 = scalar_lea.vmem %s1321_s3, %s971_s27 }
  0x13   : > { %s1219_s13 = scalar_lea.vmem %s1322_s4, %s945_s28 }
  0x17 PF: > { %v1079_v1 = vld [vmem:[%s351_s10] sm:$0xff]   ;;  %v1146_v2 = vmov 0.0   ;;  %v1080_v3 = vld [vmem:[%s351_s10 + $0x8] sm:$0xff]   ;;  %vm1147_vm1 = vmmov 0   ;;  %vm394_vm2 = vcmask 261120   ;;  %vm516_vm3 = vcmask 31744  }
  0x18   : > { %1004 = vmatprep.subr.bf16.mxu1 %v1146_v2  ;;  %996 = vmatprep.subr.bf16.mxu0 %v1146_v2  ;;  %v1081_v4 = vld [vmem:[%s346_s7] sm:$0xff]   ;;  %v370_v6 = vld [vmem:[%s1319_s1 + $0x8] sm:$0xff]  ;;  %vm609_vm4 = vcmask 64512   ;;  %s1148_s27 = smov 124   ;;  %vm639_vm5 = vcmask 1043456   ;;  %vm744_vm6 = vcmask 1041408  }
  0x19   : > { %1005 = vmatpush3.bf16.msra.mxu1 %v1079_v1  ;;  %1008 = vmatprep.mubr.msk.bf16.mxu1 %vm1147_vm1, %v1146_v2  ;;  %v369_v5 = vld [vmem:[%s1319_s1] sm:$0xff]  ;;  %v1082_v7 = vld [vmem:[%s346_s7 + $0x8] sm:$0xff]   ;;  %p965_p6 = scmp.ne.s32.totalorder %s1135_s21, 7 }
  0x1a   : > { %1006 = vmatprep.subr.bf16.mxu1 %v1146_v2  ;;  %1000 = vmatprep.mubr.msk.bf16.mxu0 %vm1147_vm1, %v1146_v2  ;;  %v365_v8 = vld [vmem:[%s1318_s0] sm:$0xff]  ;;  %v974_v9 = vpack.c.bf16 %v370_v6, %v369_v5  ;;  %v366_v10 = vld [vmem:[%s1318_s0 + $0x8] sm:$0xff] }
  0x1b   : > { %997 = vmatpush3.bf16.msra.mxu0 %v1081_v4  ;;  %v973_v11 = vpack.c.bf16 %v366_v10, %v365_v8  ;;  %v735_v58 = vld [vmem:[%s1219_s13] sm:$0x3] }
  0x1c   : > { %998 = vmatprep.subr.bf16.mxu0 %v1146_v2  ;;  %v746_v59 = vsel %vm744_vm6, %v735_v58, 0  ;;  %v733_v6 = vld [vmem:[#allocation2] sm:$0xff] }
  0x1d   : > { %1007 = vmatpush3.bf16.msra.mxu1 %v1080_v3 }
  0x1e   : > { %1018 = vmatprep.subr.bf16.mxu1 %v1146_v2 }
  0x1f   : > { %999 = vmatpush3.bf16.msra.mxu0 %v1082_v7  ;;  %v734_v7 = vld [vmem:[#allocation2 + $0x8] sm:$0xff] }
  0x20   : > { %1009 = vmatmul.mubr.msk.bf16.vlgmr.msra.gmra.mrb[0].mxu1 %vm394_vm2, %v974_v9  ;;  %1012 = vmatprep.subr.bf16.mxu0 %v1146_v2 }
  0x21   : > { %1020 = vmatprep.mubr.msk.bf16.mxu1 %vm1147_vm1, %v1146_v2 }
  0x22   : > { %1001 = vmatmul.mubr.msk.bf16.vlgmr.msra.gmra.mrb[0].mxu0 %vm394_vm2, %v973_v11 }
  0x23   : > { %1014 = vmatprep.mubr.msk.bf16.mxu0 %vm1147_vm1, %v1146_v2 }
  0xf3   : > { %v497_v12 = vpop.f32.mrb[0].mxu1 }
  0xf4   : > { %v977_v13 = vpack.c.bf16 %v497_v12, %v497_v12  ;;  %v1010_v14 = vpop.f32.mrb[1].mxu1 }
  0xf5   : > { %v500_v15 = vpop.f32.mrb[2].mxu1  ;;  %v432_v16 = vpop.f32.mrb[0].mxu0  ;;  %v966_v14 = vld [vmem:[%s1323_s5] ss:$0 sm:$0xff] (!%p965_p6) }
  0xf6   : > { %v521_v17 = vsel %vm516_vm3, %v977_v13, 0  ;;  %v978_v18 = vpack.c.bf16 %v500_v15, %v500_v15  ;;  %v1011_v19 = vpop.f32.mrb[3].mxu1  ;;  %v1002_v20 = vpop.f32.mrb[1].mxu0  ;;  %v975_v24 = vpack.c.bf16 %v432_v16, %v432_v16 }
  0xf7   : > { %1013 = vmatpush3.bf16.xpose.msra.mxu0 %v521_v17  ;;  %v435_v21 = vpop.f32.mrb[2].mxu0 }
  0xf8   : > { %v567_v22 = vsel %vm516_vm3, %v978_v18, 0  ;;  %v1003_v23 = vpop.f32.mrb[3].mxu0  ;;  %1024 = vmatprep.subr.bf16.mxu0 %v1146_v2  ;;  %v976_v25 = vpack.c.bf16 %v435_v21, %v435_v21 }
  0xf9   : > { %1019 = vmatpush3.bf16.xpose.msra.mxu1 %v567_v22 }
  0xfa   : > { %1030 = vmatprep.subr.bf16.mxu1 %v1146_v2 }
  0xfe   : > { %1015 = vmatmul.mubr.msk.bf16.vlgmr.msra.gmra.mrb[4].mxu0 %vm516_vm3, %v975_v24 }
  0xff   : > { %1026 = vmatprep.mubr.msk.bf16.mxu0 %vm1147_vm1, %v1146_v2 }
 0x100   : > { %1021 = vmatmul.mubr.msk.bf16.vlgmr.msra.gmra.mrb[4].mxu1 %vm516_vm3, %v976_v25 }
 0x101   : > { %1032 = vmatprep.mubr.msk.bf16.mxu1 %vm1147_vm1, %v1146_v2 }
 0x1d1   : > { %v557_v26 = vpop.f32.mrb[4].mxu0 }
 0x1d2   : > { %v1016_v27 = vpop.f32.mrb[5].mxu0  ;;  %v610_v28 = vsel %vm609_vm4, %v557_v26, -inf }
 0x1d3   : > { %v603_v29 = vpop.f32.mrb[4].mxu1  ;;  %611 = vmax.xlane.f32.xlu0 %v610_v28  ;;  %v560_v30 = vpop.f32.mrb[6].mxu0 }
 0x1d4   : > { %v1017_v31 = vpop.f32.mrb[7].mxu0  ;;  %v1022_v32 = vpop.f32.mrb[5].mxu1  ;;  %v613_v35 = vsel %vm609_vm4, %v603_v29, -inf }
 0x1d5   : > { %v606_v33 = vpop.f32.mrb[6].mxu1 }
 0x1d6   : > { %v1023_v34 = vpop.f32.mrb[7].mxu1 }
 0x1d7   : > { %614 = vmax.xlane.f32.xlu0 %v613_v35 }
 0x1ed   : > { %634 = vrot.lane.b32.xlu0 %v977_v13, %s1148_s27 }
 0x260   : > { %v612_v36 = vpop.xlane.xlu0 %611 }
 0x261   : > { %v616_v37 = vsub.f32 %v557_v26, %v612_v36 }
 0x263   : > { %v618_v38 = vmul.f32 1.442695, %v616_v37 }
 0x264   : > { %v615_v39 = vpop.xlane.xlu0 %614 }
 0x265   : > { %1083 = vpow2.f32 %v618_v38  ;;  %v617_v40 = vsub.f32 %v603_v29, %v615_v39 }
 0x267   : > { %v620_v41 = vmul.f32 1.442695, %v617_v40 }
 0x268   : > { %v635_v42 = vpop.permute.xlu0 %634 }
 0x269   : > { %1085 = vpow2.f32 %v620_v41  ;;  %v641_v43 = vsel %vm639_vm5, %v635_v42, 0 }
 0x26a   : > { %1025 = vmatpush3.bf16.msra.mxu0 %v641_v43 }
 0x26b   : > { %1036 = vmatprep.subr.bf16.mxu0 %v1146_v2 }
 0x26f   : > { %v1084_v44 = vpop.eup %1083 }
 0x270   : > { %v622_v45 = vsel %vm609_vm4, %v1084_v44, 0.0 }
 0x271   : > { %623 = vadd.xlane.f32.xlu1 %v622_v45 }
 0x273   : > { %v1086_v46 = vpop.eup %1085 }
 0x274   : > { %v625_v47 = vsel %vm609_vm4, %v1086_v46, 0.0 }
 0x275   : > { %626 = vadd.xlane.f32.xlu1 %v625_v47 }
 0x286   : > { %683 = vrot.lane.b32.xlu1 %v978_v18, %s1148_s27 }
 0x2fe   : > { %v624_v48 = vpop.xlane.xlu1 %623 }
 0x2ff   : > { %1087 = vrcp.f32 %v624_v48 }
 0x302   : > { %v627_v49 = vpop.xlane.xlu1 %626 }
 0x303   : > { %1089 = vrcp.f32 %v627_v49 }
 0x306   : > { %v684_v50 = vpop.permute.xlu1 %683 }
 0x307   : > { %v689_v51 = vsel %vm639_vm5, %v684_v50, 0 }
 0x308   : > { %1031 = vmatpush3.bf16.msra.mxu1 %v689_v51 }
 0x309   : > { %v1088_v52 = vpop.eup %1087 }
 0x30a   : > { %v630_v53 = vmul.f32 %v1088_v52, %v1084_v44 }
 0x30c   : > { %v632_v54 = vpack.c.bf16 %v630_v53, %v630_v53 }
 0x30d   : > { %v1090_v55 = vpop.eup %1089 }
 0x30e   : > { %v631_v56 = vmul.f32 %v1090_v55, %v1086_v46  ;;  %1027 = vmatmul.mubr.msk.bf16.vlgmr.msra.gmra.mrb[8].mxu0 %vm609_vm4, %v632_v54 }
 0x30f   : > { %1038 = vmatprep.mubr.msk.bf16.mxu0 %vm1147_vm1, %v1146_v2  ;;  %1037 = vmatpush3.bf16.msra.mxu0 %v746_v59 }
 0x310   : > { %v633_v57 = vpack.c.bf16 %v631_v56, %v631_v56 }
 0x312   : > { %1033 = vmatmul.mubr.msk.bf16.vlgmr.msra.gmra.mrb[8].mxu1 %vm609_vm4, %v633_v57 }
 0x3e1   : > { %v677_v60 = vpop.f32.mrb[8].mxu0 }
 0x3e2   : > { %v1028_v61 = vpop.f32.mrb[9].mxu0 }
 0x3e3   : > { %v680_v62 = vpop.f32.mrb[10].mxu0 }
 0x3e4   : > { %v1029_v63 = vpop.f32.mrb[11].mxu0 }
 0x3e5   : > { %v725_v0 = vpop.f32.mrb[8].mxu1 }
 0x3e6   : > { %v979_v1 = vpack.c.bf16 %v725_v0, %v677_v60  ;;  %v1034_v3 = vpop.f32.mrb[9].mxu1 }
 0x3e7   : > { %v728_v4 = vpop.f32.mrb[10].mxu1 }
 0x3e8   : > { %v1035_v5 = vpop.f32.mrb[11].mxu1  ;;  %1039 = vmatmul.mubr.msk.bf16.vlgmr.msra.gmra.mrb[12].mxu0 %vm516_vm3, %v979_v1 }
 0x4ba   : > { %796 = sbr.rel (%p965_p6) target bundleno = 1227 (0x4cb), region = 52 }
 0x4bb   : > { %v782_v2 = vpop.f32.mrb[12].mxu0 }
 0x4bc   : > { %v789_v8 = vadd.f32 %v782_v2, %v733_v6  ;;  %v1040_v9 = vpop.f32.mrb[13].mxu0 }
 0x4bd   : > { %v785_v10 = vpop.f32.mrb[14].mxu0 }
 0x4be   : > { %791 = vst.msk [vmem:[#allocation2] sm:$0xff] %vm394_vm2, %v789_v8  ;;  %v790_v11 = vadd.f32 %v785_v10, %v734_v7  ;;  %v1041_v12 = vpop.f32.mrb[15].mxu0 }
 0x4c0   : > { %792 = vst.msk [vmem:[#allocation2 + $0x8] sm:$0xff] %vm394_vm2, %v790_v11 }
 0x4c5   : > { %v797_v13 = vld [vmem:[#allocation2] sm:$0xff] }
 0x4c6   : > { %v806_v16 = vadd.f32 %v966_v14, %v797_v13 }
 0x4c7   : > { %v798_v15 = vld [vmem:[#allocation2 + $0x8] sm:$0xff] }
 0x4c8   : > { %v807_v17 = vadd.f32 %v966_v14, %v798_v15  ;;  %808 = vst.msk [vmem:[#allocation3] sm:$0xff] %vm394_vm2, %v806_v16 }
 0x4ca   : > { %809 = vst.msk [vmem:[#allocation3 + $0x8] sm:$0xff] %vm394_vm2, %v807_v17 }
 0x4cb PF: > { %p1283_p7 = scmp.eq.s32.totalorder %s935_s24, 7  ;;  %s1149_s21 = smov [#allocation3]  }
 0x4cc   : > { %s820_s7 = sshll.u32 %s1149_s21, 4  ;;  %s821_s7 = int_to_ptr.vmem [resolvable:$true] %s820_s7 }
 0x4cd   : > { %s1091_s8 = scalar_lea.vmem %s821_s7, 256  ;;  %p1098_p11 = scmp.lt.s32.totalorder %s821_s7, %s821_s7 }
 0x4ce   : > { %p1092_p8 = scmp.ne.s32.totalorder %s821_s7, %s1091_s8  ;;  %p1099_p12 = scmp.lt.s32.totalorder %s1091_s8, %s1091_s8 }
 0x4d0   : > { %p1093_p9 = pnand %p1092_p8, %p1283_p7  ;;  %p1100_p13 = por %p1099_p12, %p1098_p11 }
 0x4d2   : > { %p1094_p10 = pneg %p1093_p9 }
 0x4d4   : > { %p1101_p0 = pnand %p1100_p13, %p1094_p10 }
 0x4d6   : > { %1104 = shalt.err (!%p1101_p0)
}
 0x4d7   : > { %s1105_s24 = scalar_lea.hbm %s1324_s6, 256 }
 0x4d8   : > { %p1106_p1 = scmp.ne.s32.totalorder %s1324_s6, %s1105_s24  ;;  %p1111_p4 = scmp.lt.u32.totalorder %s1105_s24, %s1324_s6 }
 0x4da   : > { %p1107_p2 = pnand %p1106_p1, %p1283_p7 }
 0x4dc   : > { %p1108_p3 = pneg %p1107_p2 }
 0x4de   : > { %p1113_p5 = pnand %p1111_p4, %p1108_p3 }
 0x4e0   : > { %1116 = shalt.err (!%p1113_p5)
}
 0x4e1   : > { %s1150_s15 = smov 128   ;;  %s1151_s16 = smov 8  }
 0x4e2   : > { %1043 = dma.vmem_to_hbm [thread:$0]  (%p1283_p7), %s821_s7, 256, %s1324_s6, [#allocation4], %s1150_s15, %s1150_s15, %s1151_s16  }
 0x4e3   : > { %1130 = dma.done.wait (%p1283_p7), [#allocation4], 256  }
 0x4e4   : > { %1132 = vsyncadd (%p1283_p7), [#allocation4], 4294967040 }
 0x4e5 PF: > { %s17_s23 = sadd.s32 1, %s1143_s23   ;;  %s1326_s21 = smov %s1139_s22 }
 0x4e6   : > { %p14_p6 = scmp.ge.s32.totalorder %s17_s23, 10   ;;  %s1327_s22 = smov %s1329_s25 }
 0x4e8   :  { %16 = sbr.rel (!%p14_p6) target bundleno = 2 (0x2), region = 92 }
 0x4ef   :  { %836 = vsyncpa [#allocation4], 1 }
 0x4f0   :  { %838 = vsyncpa [#allocation4 + $0x1], 1 }

</bundles_post_ra>
